<compile_context>
chip_gen: v7x
topology: tpu7x:2x2x1
jax: 0.10.0
libtpu: 0.0.40
codegen_flags: <defaults>
</compile_context>

<pallas_src>
import functools

import jax
import jax.numpy as jnp
from jax.experimental import pallas as pl
from jax.experimental.pallas import tpu as pltpu


# ------------------------------- helpers ----------------------------------- #
def _round_up(x, m):
    return (x + m - 1) // m * m


# ----------------------------- Pallas kernels ------------------------------ #
def gcn_layer1_kernel(a_ref, x_ref, w1_ref, b1_ref, w2_ref, o_ref, acc_ref):
    """Computes HW2 = relu((A_hat @ X) @ W1 + b1) @ W2 for one row block.

    Grid = (row_blocks i, col_blocks k); k is the reduction over A_hat columns.
    acc_ref accumulates A_hat @ X (narrow: [tile, IN_C]) in f32.
    """
    k = pl.program_id(1)

    @pl.when(k == 0)
    def _():
        acc_ref[...] = jnp.zeros_like(acc_ref)

    # bf16 MXU operands, f32 accumulation.
    acc_ref[...] += jnp.dot(a_ref[...], x_ref[...],
                            preferred_element_type=jnp.float32)

    @pl.when(k == pl.num_programs(1) - 1)
    def _():
        ax = acc_ref[...].astype(jnp.bfloat16)                       # [T, IN]
        h = jnp.dot(ax, w1_ref[...],
                    preferred_element_type=jnp.float32)              # [T, HID]
        h = jnp.maximum(h + b1_ref[...], 0.0)                        # f32 VPU
        hw2 = jnp.dot(h.astype(jnp.bfloat16), w2_ref[...],
                      preferred_element_type=jnp.float32)            # [T, OUTp]
        o_ref[...] = hw2.astype(o_ref.dtype)


def gcn_layer2_kernel(a_ref, hw2_ref, b2_ref, o_ref, acc_ref):
    """Computes OUT = A_hat @ HW2 + b2 for one row block (k reduction)."""
    k = pl.program_id(1)

    @pl.when(k == 0)
    def _():
        acc_ref[...] = jnp.zeros_like(acc_ref)

    acc_ref[...] += jnp.dot(a_ref[...], hw2_ref[...],
                            preferred_element_type=jnp.float32)

    @pl.when(k == pl.num_programs(1) - 1)
    def _():
        o_ref[...] = acc_ref[...] + b2_ref[...]


# ------------------------------- wrapper ------------------------------------ #
@functools.partial(jax.jit, static_argnames=("tile",))
def gcn_model_pallas(a_hat, x, w1, b1, w2, b2, *, tile=None):
    n, in_c = x.shape
    hid = w1.shape[1]
    out_c = w2.shape[1]

    # Tile choice: multiples of 128 (MXU/lane alignment); cap at 512 so the
    # per-tile working set stays small even under v7x's 64 MiB VMEM.
    if tile is None:
        tile = min(512, _round_up(max(n, 8), 128))
    n_pad = _round_up(n, tile)
    out_pad = _round_up(out_c, 128)            # lane-dense output stores

    # Zero-pad + cast MXU operands to bf16 (padding rows/cols are zero, so
    # they cannot perturb real rows; padded output is sliced off below).
    a_p = jnp.zeros((n_pad, n_pad), jnp.float32).at[:n, :n].set(a_hat)
    a_p = a_p.astype(jnp.bfloat16)
    x_p = jnp.zeros((n_pad, in_c), jnp.float32).at[:n, :].set(x)
    x_p = x_p.astype(jnp.bfloat16)
    w1_b = w1.astype(jnp.bfloat16)
    b1_f = b1.reshape(1, hid).astype(jnp.float32)
    w2_p = jnp.zeros((hid, out_pad), jnp.float32).at[:, :out_c].set(w2)
    w2_p = w2_p.astype(jnp.bfloat16)
    b2_p = jnp.zeros((1, out_pad), jnp.float32).at[:, :out_c].set(
        b2.reshape(1, out_c))

    num_i = n_pad // tile
    num_k = n_pad // tile

    cparams = pltpu.CompilerParams(
        dimension_semantics=("parallel", "arbitrary"),
        vmem_limit_bytes=48 * 1024 * 1024,
    )

    # ---- Layer 1: HW2 = relu((A @ X) @ W1 + b1) @ W2   (bf16 out) ---- #
    hw2 = pl.pallas_call(
        gcn_layer1_kernel,
        out_shape=jax.ShapeDtypeStruct((n_pad, out_pad), jnp.bfloat16),
        grid_spec=pltpu.PrefetchScalarGridSpec(
            num_scalar_prefetch=0,
            grid=(num_i, num_k),
            in_specs=[
                pl.BlockSpec((tile, tile), lambda i, k: (i, k)),     # A_hat
                pl.BlockSpec((tile, in_c), lambda i, k: (k, 0)),     # X
                pl.BlockSpec((in_c, hid), lambda i, k: (0, 0)),      # W1
                pl.BlockSpec((1, hid), lambda i, k: (0, 0)),         # b1
                pl.BlockSpec((hid, out_pad), lambda i, k: (0, 0)),   # W2 (pad)
            ],
            out_specs=pl.BlockSpec((tile, out_pad), lambda i, k: (i, 0)),
            scratch_shapes=[pltpu.VMEM((tile, in_c), jnp.float32)],
        ),
        compiler_params=cparams,
    )(a_p, x_p, w1_b, b1_f, w2_p)

    # ---- Layer 2: OUT = A @ HW2 + b2   (f32 out, lane-dense) ---- #
    out_p = pl.pallas_call(
        gcn_layer2_kernel,
        out_shape=jax.ShapeDtypeStruct((n_pad, out_pad), jnp.float32),
        grid_spec=pltpu.PrefetchScalarGridSpec(
            num_scalar_prefetch=0,
            grid=(num_i, num_k),
            in_specs=[
                pl.BlockSpec((tile, tile), lambda i, k: (i, k)),     # A_hat
                pl.BlockSpec((tile, out_pad), lambda i, k: (k, 0)),  # HW2
                pl.BlockSpec((1, out_pad), lambda i, k: (0, 0)),     # b2 (pad)
            ],
            out_specs=pl.BlockSpec((tile, out_pad), lambda i, k: (i, 0)),
            scratch_shapes=[pltpu.VMEM((tile, out_pad), jnp.float32)],
        ),
        compiler_params=cparams,
    )(a_p, hw2, b2_p)

    return out_p[:n, :out_c]


# ------------------------------ JAX glue ------------------------------------ #
def build_normalized_adjacency(edge_index, edge_weight, num_nodes):
    """Dense D^-1/2 (A + I) D^-1/2, matching PyG gcn_norm (add_self_loops=True)."""
    # TODO(synk): the irregular scatter-add densification stays in plain JAX;
    # for sparse production graphs a block-mask PrefetchScalarGridSpec that
    # skips all-zero A_hat tiles would replace the dense path.
    row, col = edge_index[0], edge_index[1]          # source, target
    loop = jnp.arange(num_nodes, dtype=edge_index.dtype)
    row = jnp.concatenate([row, loop])
    col = jnp.concatenate([col, loop])
    w = jnp.concatenate(
        [edge_weight, jnp.ones((num_nodes,), edge_weight.dtype)])
    deg = jnp.zeros((num_nodes,), jnp.float32).at[col].add(w)
    deg_inv_sqrt = jnp.where(deg > 0, jax.lax.rsqrt(deg), 0.0)
    norm = deg_inv_sqrt[row] * w * deg_inv_sqrt[col]
    # out[target] += norm * x[source]  =>  A_hat[target, source] += norm
    a_hat = jnp.zeros((num_nodes, num_nodes), jnp.float32).at[col, row].add(norm)
    return a_hat


def glorot(key, fan_in, fan_out):
    limit = jnp.sqrt(6.0 / (fan_in + fan_out))
    return jax.random.uniform(key, (fan_in, fan_out), jnp.float32,
                              minval=-limit, maxval=limit)


def gcn_reference(a_hat, x, w1, b1, w2, b2):
    h = jnp.maximum(a_hat @ (x @ w1) + b1, 0.0)
    return a_hat @ (h @ w2) + b2


# --------------------------------- main ------------------------------------- #
if __name__ == "__main__":
    N = 16            # number of graph nodes
    E = 40            # number of edges
    IN_C, HID_C, OUT_C = 4, 32, 8

    key = jax.random.PRNGKey(0)
    k_x, k_src, k_dst, k_w, k_w1, k_w2 = jax.random.split(key, 6)

    x = jax.random.normal(k_x, (N, IN_C), jnp.float32)
    edge_index = jnp.stack([
        jax.random.randint(k_src, (E,), 0, N),
        jax.random.randint(k_dst, (E,), 0, N),
    ]).astype(jnp.int32)
    edge_weight = jax.random.uniform(k_w, (E,), jnp.float32,
                                     minval=0.1, maxval=1.0)

    # Parameters (glorot weights pre-transposed to [in, out], zero biases).
    w1 = glorot(k_w1, IN_C, HID_C)
    b1 = jnp.zeros((1, HID_C), jnp.float32)
    w2 = glorot(k_w2, HID_C, OUT_C)
    b2 = jnp.zeros((1, OUT_C), jnp.float32)

    a_hat = build_normalized_adjacency(edge_index, edge_weight, N)

    out = gcn_model_pallas(a_hat, x, w1, b1, w2, b2)
    out = jax.block_until_ready(out)

    ref = gcn_reference(a_hat, x, w1, b1, w2, b2)
    assert out.shape == (N, OUT_C)
    # bf16 MXU operands with f32 accumulation -> loosened tolerance vs f32 ref.
    assert jnp.allclose(out, ref, atol=5e-2, rtol=5e-2), "mismatch vs reference"

    print("KERNEL_OK")
</pallas_src>

<mosaic_0001>
module attributes {stable_mosaic.version = 11 : i64} {
  func.func @gcn_layer1_kernel(%arg0: i32, %arg1: i32, %arg2: memref<128x128xbf16, #tpu.memory_space<vmem>>, %arg3: memref<128x4xbf16, #tpu.memory_space<vmem>>, %arg4: memref<4x32xbf16, #tpu.memory_space<vmem>>, %arg5: memref<1x32xf32, #tpu.memory_space<vmem>>, %arg6: memref<32x128xbf16, #tpu.memory_space<vmem>>, %arg7: memref<128x128xbf16, #tpu.memory_space<vmem>>, %arg8: memref<128x4xf32, #tpu.memory_space<vmem>>) attributes {dimension_semantics = [#tpu.dimension_semantics<parallel>, #tpu.dimension_semantics<arbitrary>], iteration_bounds = array<i64: 1, 1>, scalar_prefetch = 0 : i64, scratch_operands = 1 : i64, tpu.core_type = #tpu.core_type<tc>, window_params = [{transform_indices = @transform_0, window_bounds = array<i64: 128, 128>}, {transform_indices = @transform_1, window_bounds = array<i64: 128, 4>}, {pipeline_mode = #tpu.pipeline_mode<synchronous>, transform_indices = @transform_2, window_bounds = array<i64: 4, 32>}, {pipeline_mode = #tpu.pipeline_mode<synchronous>, transform_indices = @transform_3, window_bounds = array<i64: 1, 32>}, {pipeline_mode = #tpu.pipeline_mode<synchronous>, transform_indices = @transform_4, window_bounds = array<i64: 32, 128>}, {transform_indices = @transform_5, window_bounds = array<i64: 128, 128>}]} {
    %c0_i32 = arith.constant 0 : i32
    %0 = arith.cmpi eq, %arg1, %c0_i32 : i32
    %1 = arith.extui %0 : i1 to i32
    %c0_i32_0 = arith.constant 0 : i32
    %2 = arith.cmpi ne, %1, %c0_i32_0 : i32
    scf.if %2 {
      %cst_10 = arith.constant 0.000000e+00 : f32
      %12 = vector.broadcast %cst_10 : f32 to vector<128x4xf32>
      %c0_11 = arith.constant 0 : index
      %c0_12 = arith.constant 0 : index
      %13 = vector.load %arg8[%c0_11, %c0_12] : memref<128x4xf32, #tpu.memory_space<vmem>>, vector<128x4xf32>
      tpu.vector_store %arg8[%c0_11, %c0_12], %12 {strides = array<i32>} : memref<128x4xf32, #tpu.memory_space<vmem>>, vector<128x4xf32>,
    } else {
    }
    %c0 = arith.constant 0 : index
    %c0_1 = arith.constant 0 : index
    %3 = vector.load %arg8[%c0, %c0_1] : memref<128x4xf32, #tpu.memory_space<vmem>>, vector<128x4xf32>
    %c0_2 = arith.constant 0 : index
    %c0_3 = arith.constant 0 : index
    %4 = vector.load %arg2[%c0_2, %c0_3] : memref<128x128xbf16, #tpu.memory_space<vmem>>, vector<128x128xbf16>
    %c0_4 = arith.constant 0 : index
    %c0_5 = arith.constant 0 : index
    %5 = vector.load %arg3[%c0_4, %c0_5] : memref<128x4xbf16, #tpu.memory_space<vmem>>, vector<128x4xbf16>
    %cst = arith.constant dense<0.000000e+00> : vector<128x4xf32>
    %6 = tpu.matmul %4, %5, %cst {dimension_numbers = #tpu.dot_dimension_numbers<[1], [0], [0], [1], [0, 0, 1, 1], [], []>} : vector<128x128xbf16>, vector<128x4xbf16>, vector<128x4xf32> -> vector<128x4xf32>
    %7 = arith.addf %3, %6 : vector<128x4xf32>
    %c0_6 = arith.constant 0 : index
    %c0_7 = arith.constant 0 : index
    %8 = vector.load %arg8[%c0_6, %c0_7] : memref<128x4xf32, #tpu.memory_space<vmem>>, vector<128x4xf32>
    tpu.vector_store %arg8[%c0_6, %c0_7], %7 {strides = array<i32>} : memref<128x4xf32, #tpu.memory_space<vmem>>, vector<128x4xf32>,
    %c0_i32_8 = arith.constant 0 : i32
    %9 = arith.cmpi eq, %arg1, %c0_i32_8 : i32
    %10 = arith.extui %9 : i1 to i32
    %c0_i32_9 = arith.constant 0 : i32
    %11 = arith.cmpi ne, %10, %c0_i32_9 : i32
    scf.if %11 {
      %c0_10 = arith.constant 0 : index
      %c0_11 = arith.constant 0 : index
      %12 = vector.load %arg8[%c0_10, %c0_11] : memref<128x4xf32, #tpu.memory_space<vmem>>, vector<128x4xf32>
      %13 = arith.truncf %12 : vector<128x4xf32> to vector<128x4xbf16>
      %c0_12 = arith.constant 0 : index
      %c0_13 = arith.constant 0 : index
      %14 = vector.load %arg4[%c0_12, %c0_13] : memref<4x32xbf16, #tpu.memory_space<vmem>>, vector<4x32xbf16>
      %cst_14 = arith.constant dense<0.000000e+00> : vector<128x32xf32>
      %15 = tpu.matmul %13, %14, %cst_14 {dimension_numbers = #tpu.dot_dimension_numbers<[1], [0], [0], [1], [0, 0, 1, 1], [], []>} : vector<128x4xbf16>, vector<4x32xbf16>, vector<128x32xf32> -> vector<128x32xf32>
      %c0_15 = arith.constant 0 : index
      %c0_16 = arith.constant 0 : index
      %16 = vector.load %arg5[%c0_15, %c0_16] : memref<1x32xf32, #tpu.memory_space<vmem>>, vector<1x32xf32>
      %17 = vector.broadcast %16 : vector<1x32xf32> to vector<128x32xf32>
      %18 = arith.addf %15, %17 : vector<128x32xf32>
      %cst_17 = arith.constant 0.000000e+00 : f32
      %19 = vector.broadcast %cst_17 : f32 to vector<128x32xf32>
      %20 = arith.maximumf %18, %19 : vector<128x32xf32>
      %21 = arith.truncf %20 : vector<128x32xf32> to vector<128x32xbf16>
      %c0_18 = arith.constant 0 : index
      %c0_19 = arith.constant 0 : index
      %22 = vector.load %arg6[%c0_18, %c0_19] : memref<32x128xbf16, #tpu.memory_space<vmem>>, vector<32x128xbf16>
      %cst_20 = arith.constant dense<0.000000e+00> : vector<128x128xf32>
      %23 = tpu.matmul %21, %22, %cst_20 {dimension_numbers = #tpu.dot_dimension_numbers<[1], [0], [0], [1], [0, 0, 1, 1], [], []>} : vector<128x32xbf16>, vector<32x128xbf16>, vector<128x128xf32> -> vector<128x128xf32>
      %24 = arith.truncf %23 : vector<128x128xf32> to vector<128x128xbf16>
      %c0_21 = arith.constant 0 : index
      %c0_22 = arith.constant 0 : index
      %25 = vector.load %arg7[%c0_21, %c0_22] : memref<128x128xbf16, #tpu.memory_space<vmem>>, vector<128x128xbf16>
      tpu.vector_store %arg7[%c0_21, %c0_22], %24 {strides = array<i32>} : memref<128x128xbf16, #tpu.memory_space<vmem>>, vector<128x128xbf16>,
    } else {
    }
    return
  }
  func.func @transform_0(%arg0: i32, %arg1: i32) -> (i32, i32) {
    %c0_i32 = arith.constant 0 : i32
    return %arg0, %arg1 : i32, i32
  }
  func.func @transform_1(%arg0: i32, %arg1: i32) -> (i32, i32) {
    %c0_i32 = arith.constant 0 : i32
    %c0_i32_0 = arith.constant 0 : i32
    return %arg1, %c0_i32 : i32, i32
  }
  func.func @transform_2(%arg0: i32, %arg1: i32) -> (i32, i32) {
    %c0_i32 = arith.constant 0 : i32
    %c0_i32_0 = arith.constant 0 : i32
    %c0_i32_1 = arith.constant 0 : i32
    return %c0_i32, %c0_i32_0 : i32, i32
  }
  func.func @transform_3(%arg0: i32, %arg1: i32) -> (i32, i32) {
    %c0_i32 = arith.constant 0 : i32
    %c0_i32_0 = arith.constant 0 : i32
    %c0_i32_1 = arith.constant 0 : i32
    return %c0_i32, %c0_i32_0 : i32, i32
  }
  func.func @transform_4(%arg0: i32, %arg1: i32) -> (i32, i32) {
    %c0_i32 = arith.constant 0 : i32
    %c0_i32_0 = arith.constant 0 : i32
    %c0_i32_1 = arith.constant 0 : i32
    return %c0_i32, %c0_i32_0 : i32, i32
  }
  func.func @transform_5(%arg0: i32, %arg1: i32) -> (i32, i32) {
    %c0_i32 = arith.constant 0 : i32
    %c0_i32_0 = arith.constant 0 : i32
    return %arg0, %c0_i32 : i32, i32
  }
}

module attributes {stable_mosaic.version = 11 : i64} {
  func.func @gcn_layer2_kernel(%arg0: i32, %arg1: i32, %arg2: memref<128x128xbf16, #tpu.memory_space<vmem>>, %arg3: memref<128x128xbf16, #tpu.memory_space<vmem>>, %arg4: memref<1x128xf32, #tpu.memory_space<vmem>>, %arg5: memref<128x128xf32, #tpu.memory_space<vmem>>, %arg6: memref<128x128xf32, #tpu.memory_space<vmem>>) attributes {dimension_semantics = [#tpu.dimension_semantics<parallel>, #tpu.dimension_semantics<arbitrary>], iteration_bounds = array<i64: 1, 1>, scalar_prefetch = 0 : i64, scratch_operands = 1 : i64, tpu.core_type = #tpu.core_type<tc>, window_params = [{transform_indices = @transform_0, window_bounds = array<i64: 128, 128>}, {transform_indices = @transform_1, window_bounds = array<i64: 128, 128>}, {pipeline_mode = #tpu.pipeline_mode<synchronous>, transform_indices = @transform_2, window_bounds = array<i64: 1, 128>}, {transform_indices = @transform_3, window_bounds = array<i64: 128, 128>}]} {
    %c0_i32 = arith.constant 0 : i32
    %0 = arith.cmpi eq, %arg1, %c0_i32 : i32
    %1 = arith.extui %0 : i1 to i32
    %c0_i32_0 = arith.constant 0 : i32
    %2 = arith.cmpi ne, %1, %c0_i32_0 : i32
    scf.if %2 {
      %cst_10 = arith.constant 0.000000e+00 : f32
      %12 = vector.broadcast %cst_10 : f32 to vector<128x128xf32>
      %c0_11 = arith.constant 0 : index
      %c0_12 = arith.constant 0 : index
      %13 = vector.load %arg6[%c0_11, %c0_12] : memref<128x128xf32, #tpu.memory_space<vmem>>, vector<128x128xf32>
      tpu.vector_store %arg6[%c0_11, %c0_12], %12 {strides = array<i32>} : memref<128x128xf32, #tpu.memory_space<vmem>>, vector<128x128xf32>,
    } else {
    }
    %c0 = arith.constant 0 : index
    %c0_1 = arith.constant 0 : index
    %3 = vector.load %arg6[%c0, %c0_1] : memref<128x128xf32, #tpu.memory_space<vmem>>, vector<128x128xf32>
    %c0_2 = arith.constant 0 : index
    %c0_3 = arith.constant 0 : index
    %4 = vector.load %arg2[%c0_2, %c0_3] : memref<128x128xbf16, #tpu.memory_space<vmem>>, vector<128x128xbf16>
    %c0_4 = arith.constant 0 : index
    %c0_5 = arith.constant 0 : index
    %5 = vector.load %arg3[%c0_4, %c0_5] : memref<128x128xbf16, #tpu.memory_space<vmem>>, vector<128x128xbf16>
    %cst = arith.constant dense<0.000000e+00> : vector<128x128xf32>
    %6 = tpu.matmul %4, %5, %cst {dimension_numbers = #tpu.dot_dimension_numbers<[1], [0], [0], [1], [0, 0, 1, 1], [], []>} : vector<128x128xbf16>, vector<128x128xbf16>, vector<128x128xf32> -> vector<128x128xf32>
    %7 = arith.addf %3, %6 : vector<128x128xf32>
    %c0_6 = arith.constant 0 : index
    %c0_7 = arith.constant 0 : index
    %8 = vector.load %arg6[%c0_6, %c0_7] : memref<128x128xf32, #tpu.memory_space<vmem>>, vector<128x128xf32>
    tpu.vector_store %arg6[%c0_6, %c0_7], %7 {strides = array<i32>} : memref<128x128xf32, #tpu.memory_space<vmem>>, vector<128x128xf32>,
    %c0_i32_8 = arith.constant 0 : i32
    %9 = arith.cmpi eq, %arg1, %c0_i32_8 : i32
    %10 = arith.extui %9 : i1 to i32
    %c0_i32_9 = arith.constant 0 : i32
    %11 = arith.cmpi ne, %10, %c0_i32_9 : i32
    scf.if %11 {
      %c0_10 = arith.constant 0 : index
      %c0_11 = arith.constant 0 : index
      %12 = vector.load %arg6[%c0_10, %c0_11] : memref<128x128xf32, #tpu.memory_space<vmem>>, vector<128x128xf32>
      %c0_12 = arith.constant 0 : index
      %c0_13 = arith.constant 0 : index
      %13 = vector.load %arg4[%c0_12, %c0_13] : memref<1x128xf32, #tpu.memory_space<vmem>>, vector<1x128xf32>
      %14 = vector.broadcast %13 : vector<1x128xf32> to vector<128x128xf32>
      %15 = arith.addf %12, %14 : vector<128x128xf32>
      %c0_14 = arith.constant 0 : index
      %c0_15 = arith.constant 0 : index
      %16 = vector.load %arg5[%c0_14, %c0_15] : memref<128x128xf32, #tpu.memory_space<vmem>>, vector<128x128xf32>
      tpu.vector_store %arg5[%c0_14, %c0_15], %15 {strides = array<i32>} : memref<128x128xf32, #tpu.memory_space<vmem>>, vector<128x128xf32>,
    } else {
    }
    return
  }
  func.func @transform_0(%arg0: i32, %arg1: i32) -> (i32, i32) {
    %c0_i32 = arith.constant 0 : i32
    return %arg0, %arg1 : i32, i32
  }
  func.func @transform_1(%arg0: i32, %arg1: i32) -> (i32, i32) {
    %c0_i32 = arith.constant 0 : i32
    %c0_i32_0 = arith.constant 0 : i32
    return %arg1, %c0_i32 : i32, i32
  }
  func.func @transform_2(%arg0: i32, %arg1: i32) -> (i32, i32) {
    %c0_i32 = arith.constant 0 : i32
    %c0_i32_0 = arith.constant 0 : i32
    %c0_i32_1 = arith.constant 0 : i32
    return %c0_i32, %c0_i32_0 : i32, i32
  }
  func.func @transform_3(%arg0: i32, %arg1: i32) -> (i32, i32) {
    %c0_i32 = arith.constant 0 : i32
    %c0_i32_0 = arith.constant 0 : i32
    return %arg0, %c0_i32 : i32, i32
  }
}

</mosaic_0001>

<bundles_post_ra>
// kernel: gcn_model_pallas.3
= control target key start
LH: loop header
LB: loop body
LE: loop exit
PB: predicated region body
PF: predicated region fallthrough
CT: control target
= control target key end

     0   :  { %s586_s1 = inlined_call_operand.vmem [shape: bf16[128,128], index: 1, kind: input, shape index: {}]   ;;  %s587_s0 = inlined_call_operand.vmem [shape: bf16[128,128], index: 0, kind: input, shape index: {}]   ;;  %s588_s2 = inlined_call_operand.vmem [shape: f32[1,128], index: 2, kind: input, shape index: {}]   ;;  %s589_s3 = inlined_call_operand.vmem [shape: f32[128,128], index: 3, kind: output, shape index: {}]  }
   0x1   :  { %v451_v0 = vld [vmem:[%s586_s1] sm:$0xff]   ;;  %v452_v1 = vld [vmem:[%s586_s1 + $0x8] sm:$0xff]   ;;  %v453_v2 = vld [vmem:[%s586_s1 + $0x10] sm:$0xff]  }
   0x2   :  { %403 = vmatprep.subr.bf16.mxu0 %v451_v0  ;;  %435 = vmatprep.subr.bf16.mxu1 %v451_v0  ;;  %v454_v3 = vld [vmem:[%s586_s1 + $0x18] sm:$0xff]   ;;  %v459_v4 = vld [vmem:[%s587_s0] sm:$0xff]   ;;  %v456_v7 = vld [vmem:[%s586_s1 + $0x28] sm:$0xff]  }
   0x3   :  { %404 = vmatpush3.bf16.msra.mxu0 %v451_v0  ;;  %443 = vmatpush3.bf16.msra.mxu1 %v451_v0  ;;  %v460_v5 = vld [vmem:[%s587_s0 + $0x20] sm:$0xff]   ;;  %v457_v8 = vld [vmem:[%s586_s1 + $0x30] sm:$0xff]   ;;  %v458_v9 = vld [vmem:[%s586_s1 + $0x38] sm:$0xff]  }
   0x4   :  { %405 = vmatprep.subr.bf16.mxu0 %v452_v1  ;;  %436 = vmatprep.subr.bf16.mxu1 %v452_v1  ;;  %v455_v6 = vld [vmem:[%s586_s1 + $0x20] sm:$0xff]   ;;  %v461_v10 = vld [vmem:[%s587_s0 + $0x8] sm:$0xff]   ;;  %v463_v12 = vld [vmem:[%s587_s0 + $0x10] sm:$0xff]  }
   0x5   :  { %419 = vmatprep.mubr.bf16.mxu0 %v459_v4  ;;  %427 = vmatprep.mubr.bf16.mxu1 %v460_v5  ;;  %v462_v11 = vld [vmem:[%s587_s0 + $0x28] sm:$0xff]   ;;  %v464_v13 = vld [vmem:[%s587_s0 + $0x30] sm:$0xff]   ;;  %v465_v14 = vld [vmem:[%s587_s0 + $0x18] sm:$0xff]  }
   0x6   :  { %v466_v15 = vld [vmem:[%s587_s0 + $0x38] sm:$0xff]   ;;  %v386_v16 = vld [vmem:[%s588_s2] ss:$0 sm:$0xff] }
   0x7   :  { %406 = vmatpush3.bf16.msra.mxu0 %v452_v1  ;;  %444 = vmatpush3.bf16.msra.mxu1 %v452_v1 }
   0x8   :  { %407 = vmatprep.subr.bf16.mxu0 %v453_v2  ;;  %437 = vmatprep.subr.bf16.mxu1 %v453_v2 }
   0xb   :  { %408 = vmatpush3.bf16.msra.mxu0 %v453_v2  ;;  %445 = vmatpush3.bf16.msra.mxu1 %v453_v2 }
   0xc   :  { %409 = vmatprep.subr.bf16.mxu0 %v454_v3  ;;  %438 = vmatprep.subr.bf16.mxu1 %v454_v3 }
   0xf   :  { %410 = vmatpush3.bf16.msra.mxu0 %v454_v3  ;;  %446 = vmatpush3.bf16.msra.mxu1 %v454_v3 }
  0x10   :  { %411 = vmatprep.subr.bf16.mxu0 %v455_v6  ;;  %439 = vmatprep.subr.bf16.mxu1 %v455_v6 }
  0x13   :  { %412 = vmatpush3.bf16.msra.mxu0 %v455_v6  ;;  %447 = vmatpush3.bf16.msra.mxu1 %v455_v6 }
  0x14   :  { %413 = vmatprep.subr.bf16.mxu0 %v456_v7  ;;  %440 = vmatprep.subr.bf16.mxu1 %v456_v7 }
  0x17   :  { %414 = vmatpush3.bf16.msra.mxu0 %v456_v7  ;;  %448 = vmatpush3.bf16.msra.mxu1 %v456_v7 }
  0x18   :  { %415 = vmatprep.subr.bf16.mxu0 %v457_v8  ;;  %441 = vmatprep.subr.bf16.mxu1 %v457_v8 }
  0x1b   :  { %416 = vmatpush3.bf16.msra.mxu0 %v457_v8  ;;  %449 = vmatpush3.bf16.msra.mxu1 %v457_v8 }
  0x1c   :  { %417 = vmatprep.subr.bf16.mxu0 %v458_v9  ;;  %442 = vmatprep.subr.bf16.mxu1 %v458_v9 }
  0x1f   :  { %418 = vmatpush3.bf16.msra.mxu0 %v458_v9  ;;  %450 = vmatpush3.bf16.msra.mxu1 %v458_v9 }
  0x22   :  { %420 = vmatmul.mubr.bf16.vlgmr.msra.gmra.mrb[0].mxu0 %v461_v10  ;;  %428 = vmatmul.mubr.bf16.vlgmr.msra.gmra.mrb[0].mxu1 %v462_v11 }
  0x23   :  { %423 = vmatprep.mubr.bf16.mxu0 %v463_v12  ;;  %431 = vmatprep.mubr.bf16.mxu1 %v464_v13 }
  0x2a   :  { %424 = vmatmul.mubr.bf16.gmra.mrb[4].mxu0 %v465_v14  ;;  %432 = vmatmul.mubr.bf16.gmra.mrb[4].mxu1 %v466_v15 }
  0xf5   :  { %v421_v17 = vpop.f32.mrb[0].mxu0  ;;  %v429_v18 = vpop.f32.mrb[0].mxu1 }
  0xf6   :  { %v336_v19 = vadd.f32 %v421_v17, %v386_v16  ;;  %v344_v20 = vadd.f32 %v429_v18, %v386_v16  ;;  %v213_v21 = vpop.f32.mrb[1].mxu0  ;;  %v245_v22 = vpop.f32.mrb[1].mxu1 }
  0xf7   :  { %v334_v23 = vadd.f32 %v386_v16, %v213_v21  ;;  %v342_v24 = vadd.f32 %v386_v16, %v245_v22  ;;  %v422_v25 = vpop.f32.mrb[2].mxu0  ;;  %v430_v26 = vpop.f32.mrb[2].mxu1 }
  0xf8   :  { %352 = vst [vmem:[%s589_s3 + $0x10] sm:$0xff] %v336_v19  ;;  %360 = vst [vmem:[%s589_s3 + $0x50] sm:$0xff] %v344_v20  ;;  %v337_v27 = vadd.f32 %v422_v25, %v386_v16  ;;  %v345_v28 = vadd.f32 %v430_v26, %v386_v16  ;;  %v216_v29 = vpop.f32.mrb[3].mxu0  ;;  %v248_v30 = vpop.f32.mrb[3].mxu1 }
  0xf9   :  { %350 = vst [vmem:[%s589_s3] sm:$0xff] %v334_v23  ;;  %358 = vst [vmem:[%s589_s3 + $0x40] sm:$0xff] %v342_v24  ;;  %v335_v31 = vadd.f32 %v386_v16, %v216_v29  ;;  %v343_v32 = vadd.f32 %v386_v16, %v248_v30 }
  0xfa   :  { %353 = vst [vmem:[%s589_s3 + $0x18] sm:$0xff] %v337_v27  ;;  %361 = vst [vmem:[%s589_s3 + $0x58] sm:$0xff] %v345_v28 }
  0xfb   :  { %351 = vst [vmem:[%s589_s3 + $0x8] sm:$0xff] %v335_v31  ;;  %359 = vst [vmem:[%s589_s3 + $0x48] sm:$0xff] %v343_v32 }
  0xfd   :  { %v425_v33 = vpop.f32.mrb[4].mxu0  ;;  %v433_v34 = vpop.f32.mrb[4].mxu1 }
  0xfe   :  { %v340_v35 = vadd.f32 %v425_v33, %v386_v16  ;;  %v348_v36 = vadd.f32 %v433_v34, %v386_v16  ;;  %v229_v37 = vpop.f32.mrb[5].mxu0  ;;  %v261_v38 = vpop.f32.mrb[5].mxu1 }
  0xff   :  { %v338_v39 = vadd.f32 %v386_v16, %v229_v37  ;;  %v346_v40 = vadd.f32 %v386_v16, %v261_v38  ;;  %v426_v41 = vpop.f32.mrb[6].mxu0  ;;  %v434_v42 = vpop.f32.mrb[6].mxu1 }
 0x100   :  { %356 = vst [vmem:[%s589_s3 + $0x30] sm:$0xff] %v340_v35  ;;  %364 = vst [vmem:[%s589_s3 + $0x70] sm:$0xff] %v348_v36  ;;  %v341_v43 = vadd.f32 %v426_v41, %v386_v16  ;;  %v349_v44 = vadd.f32 %v434_v42, %v386_v16  ;;  %v232_v45 = vpop.f32.mrb[7].mxu0  ;;  %v264_v46 = vpop.f32.mrb[7].mxu1 }
 0x101   :  { %354 = vst [vmem:[%s589_s3 + $0x20] sm:$0xff] %v338_v39  ;;  %362 = vst [vmem:[%s589_s3 + $0x60] sm:$0xff] %v346_v40  ;;  %v339_v47 = vadd.f32 %v386_v16, %v232_v45  ;;  %v347_v48 = vadd.f32 %v386_v16, %v264_v46 }
 0x102   :  { %357 = vst [vmem:[%s589_s3 + $0x38] sm:$0xff] %v341_v43  ;;  %365 = vst [vmem:[%s589_s3 + $0x78] sm:$0xff] %v349_v44 }
 0x103   :  { %355 = vst [vmem:[%s589_s3 + $0x28] sm:$0xff] %v339_v47  ;;  %363 = vst [vmem:[%s589_s3 + $0x68] sm:$0xff] %v347_v48 }

// kernel: gcn_model_pallas.2
= control target key start
LH: loop header
LB: loop body
LE: loop exit
PB: predicated region body
PF: predicated region fallthrough
CT: control target
= control target key end

     0   :  { %vm25_vm0 = vcmask 31744   ;;  %v961_v1 = vmov 0.0   ;;  %vm375_vm1 = vcmask 1041408   ;;  %vm516_vm2 = vcmask 261120   ;;  %s1124_s1 = inlined_call_operand.vmem [shape: bf16[128,4], index: 1, kind: input, shape index: {}]   ;;  %s1125_s0 = inlined_call_operand.vmem [shape: bf16[128,128], index: 0, kind: input, shape index: {}]   ;;  %s1126_s2 = inlined_call_operand.vmem [shape: bf16[4,32], index: 2, kind: input, shape index: {}]   ;;  %s1127_s4 = inlined_call_operand.vmem [shape: bf16[32,128], index: 4, kind: input, shape index: {}]   ;;  %s1128_s3 = inlined_call_operand.vmem [shape: f32[1,32], index: 3, kind: input, shape index: {}]   ;;  %s1129_s5 = inlined_call_operand.vmem [shape: bf16[128,128], index: 5, kind: output, shape index: {}]  }
   0x1   :  { %v943_v0 = vld [vmem:[%s1124_s1] sm:$0xff]   ;;  %28 = vst.msk [vmem:[#allocation2 + $0x10] sm:$0xff] %vm25_vm0, %v961_v1  ;;  %26 = vst.msk [vmem:[#allocation2] sm:$0xff] %vm25_vm0, %v961_v1  ;;  %v944_v2 = vld [vmem:[%s1124_s1 + $0x8] sm:$0xff]  }
   0x2   :  { %27 = vst.msk [vmem:[#allocation2 + $0x8] sm:$0xff] %vm25_vm0, %v961_v1  ;;  %29 = vst.msk [vmem:[#allocation2 + $0x18] sm:$0xff] %vm25_vm0, %v961_v1  ;;  %871 = vmatprep.subr.bf16.mxu0 %v943_v0  ;;  %v945_v3 = vld [vmem:[%s1124_s1 + $0x10] sm:$0xff]   ;;  %v946_v4 = vld [vmem:[%s1124_s1 + $0x18] sm:$0xff]  }
   0x3   :  { %30 = vst.msk [vmem:[#allocation2 + $0x20] sm:$0xff] %vm25_vm0, %v961_v1  ;;  %31 = vst.msk [vmem:[#allocation2 + $0x28] sm:$0xff] %vm25_vm0, %v961_v1  ;;  %872 = vmatpush3.bf16.msra.mxu0 %v943_v0  ;;  %v951_v5 = vld [vmem:[%s1125_s0] sm:$0xff]   ;;  %v948_v7 = vld [vmem:[%s1124_s1 + $0x28] sm:$0xff]  }
   0x4   :  { %32 = vst.msk [vmem:[#allocation2 + $0x30] sm:$0xff] %vm25_vm0, %v961_v1  ;;  %33 = vst.msk [vmem:[#allocation2 + $0x38] sm:$0xff] %vm25_vm0, %v961_v1  ;;  %873 = vmatprep.subr.bf16.mxu0 %v944_v2  ;;  %887 = vmatprep.mubr.bf16.mxu0 %v951_v5  ;;  %v947_v6 = vld [vmem:[%s1124_s1 + $0x20] sm:$0xff]   ;;  %v949_v8 = vld [vmem:[%s1124_s1 + $0x30] sm:$0xff]  }
   0x5   :  { %34 = vst.msk [vmem:[#allocation2 + $0x40] sm:$0xff] %vm25_vm0, %v961_v1  ;;  %35 = vst.msk [vmem:[#allocation2 + $0x48] sm:$0xff] %vm25_vm0, %v961_v1  ;;  %v950_v9 = vld [vmem:[%s1124_s1 + $0x38] sm:$0xff]   ;;  %v952_v10 = vld [vmem:[%s1125_s0 + $0x8] sm:$0xff]  }
   0x6   :  { %36 = vst.msk [vmem:[#allocation2 + $0x50] sm:$0xff] %vm25_vm0, %v961_v1  ;;  %37 = vst.msk [vmem:[#allocation2 + $0x58] sm:$0xff] %vm25_vm0, %v961_v1  ;;  %v953_v11 = vld [vmem:[%s1125_s0 + $0x10] sm:$0xff]   ;;  %v954_v12 = vld [vmem:[%s1125_s0 + $0x18] sm:$0xff]  }
   0x7   :  { %38 = vst.msk [vmem:[#allocation2 + $0x60] sm:$0xff] %vm25_vm0, %v961_v1  ;;  %39 = vst.msk [vmem:[#allocation2 + $0x68] sm:$0xff] %vm25_vm0, %v961_v1  ;;  %874 = vmatpush3.bf16.msra.mxu0 %v944_v2  ;;  %v955_v13 = vld [vmem:[%s1125_s0 + $0x20] sm:$0xff]   ;;  %v956_v14 = vld [vmem:[%s1125_s0 + $0x28] sm:$0xff]  }
   0x8   :  { %40 = vst.msk [vmem:[#allocation2 + $0x70] sm:$0xff] %vm25_vm0, %v961_v1  ;;  %41 = vst.msk [vmem:[#allocation2 + $0x78] sm:$0xff] %vm25_vm0, %v961_v1  ;;  %875 = vmatprep.subr.bf16.mxu0 %v945_v3  ;;  %v957_v15 = vld [vmem:[%s1125_s0 + $0x30] sm:$0xff]   ;;  %v958_v16 = vld [vmem:[%s1125_s0 + $0x38] sm:$0xff]  }
   0x9   :  { %v343_v17 = vld [vmem:[%s1126_s2] sm:$0x3]  ;;  %v44_v20 = vld [vmem:[#allocation2 + $0x10] sm:$0xff]  ;;  %v45_v23 = vld [vmem:[#allocation2 + $0x18] sm:$0xff] }
   0xa   :  { %941 = vmatprep.subr.msk.bf16.mxu1 %vm375_vm1, %v343_v17  ;;  %v377_v18 = vsel %vm375_vm1, %v343_v17, 0  ;;  %v959_v19 = vld [vmem:[%s1127_s4] sm:$0xff]   ;;  %v43_v26 = vld [vmem:[#allocation2 + $0x8] sm:$0xff] }
   0xb   :  { %876 = vmatpush3.bf16.msra.mxu0 %v945_v3  ;;  %904 = vmatpush3.bf16.msra.mxu1 %v377_v18  ;;  %v42_v21 = vld [vmem:[#allocation2] sm:$0xff]  ;;  %v48_v32 = vld [vmem:[#allocation2 + $0x30] sm:$0xff]  ;;  %v49_v35 = vld [vmem:[#allocation2 + $0x38] sm:$0xff] }
   0xc   :  { %877 = vmatprep.subr.bf16.mxu0 %v946_v4  ;;  %921 = vmatprep.subr.bf16.mxu1 %v959_v19  ;;  %v46_v33 = vld [vmem:[#allocation2 + $0x20] sm:$0xff]  ;;  %v47_v38 = vld [vmem:[#allocation2 + $0x28] sm:$0xff] }
   0xd   :  { %v52_v47 = vld [vmem:[#allocation2 + $0x50] sm:$0xff]  ;;  %v50_v50 = vld [vmem:[#allocation2 + $0x40] sm:$0xff]  ;;  %v960_v52 = vld [vmem:[%s1127_s4 + $0x8] sm:$0xff]  }
   0xe   :  { %v53_v54 = vld [vmem:[#allocation2 + $0x58] sm:$0xff]  ;;  %v51_v57 = vld [vmem:[#allocation2 + $0x48] sm:$0xff]  ;;  %v54_v5 = vld [vmem:[#allocation2 + $0x60] sm:$0xff] }
   0xf   :  { %878 = vmatpush3.bf16.msra.mxu0 %v946_v4  ;;  %v56_v2 = vld [vmem:[#allocation2 + $0x70] sm:$0xff] }
  0x10   :  { %879 = vmatprep.subr.bf16.mxu0 %v947_v6 }
  0x13   :  { %880 = vmatpush3.bf16.msra.mxu0 %v947_v6 }
  0x14   :  { %881 = vmatprep.subr.bf16.mxu0 %v948_v7 }
  0x17   :  { %882 = vmatpush3.bf16.msra.mxu0 %v948_v7 }
  0x18   :  { %883 = vmatprep.subr.bf16.mxu0 %v949_v8 }
  0x1b   :  { %884 = vmatpush3.bf16.msra.mxu0 %v949_v8  ;;  %v57_v8 = vld [vmem:[#allocation2 + $0x78] sm:$0xff] }
  0x1c   :  { %885 = vmatprep.subr.bf16.mxu0 %v950_v9 }
  0x1f   :  { %886 = vmatpush3.bf16.msra.mxu0 %v950_v9 }
  0x22   :  { %888 = vmatmul.mubr.bf16.vlgmr.msra.gmra.mrb[0].mxu0 %v952_v10 }
  0x23   :  { %891 = vmatprep.mubr.bf16.mxu0 %v953_v11  ;;  %v55_v11 = vld [vmem:[#allocation2 + $0x68] sm:$0xff] }
  0x2a   :  { %892 = vmatmul.mubr.bf16.gmra.mrb[4].mxu0 %v954_v12 }
  0x2b   :  { %895 = vmatprep.mubr.bf16.mxu0 %v955_v13 }
  0x32   :  { %896 = vmatmul.mubr.bf16.gmra.mrb[8].mxu0 %v956_v14 }
  0x33   :  { %899 = vmatprep.mubr.bf16.mxu0 %v957_v15 }
  0x3a   :  { %900 = vmatmul.mubr.bf16.gmra.mrb[12].mxu0 %v958_v16 }
  0xf5   :  { %v889_v22 = vpop.f32.mrb[0].mxu0 }
  0xf6   :  { %v285_v24 = vadd.f32 %v889_v22, %v44_v20  ;;  %v220_v25 = vpop.f32.mrb[1].mxu0 }
  0xf7   :  { %v283_v27 = vadd.f32 %v220_v25, %v42_v21  ;;  %v890_v28 = vpop.f32.mrb[2].mxu0 }
  0xf8   :  { %302 = vst.msk [vmem:[#allocation2 + $0x10] sm:$0xff] %vm25_vm0, %v285_v24  ;;  %v286_v29 = vadd.f32 %v890_v28, %v45_v23  ;;  %v223_v30 = vpop.f32.mrb[3].mxu0 }
  0xf9   :  { %300 = vst.msk [vmem:[#allocation2] sm:$0xff] %vm25_vm0, %v283_v27  ;;  %v284_v31 = vadd.f32 %v223_v30, %v43_v26 }
  0xfa   :  { %303 = vst.msk [vmem:[#allocation2 + $0x18] sm:$0xff] %vm25_vm0, %v286_v29  ;;  %v738_v29 = vld [vmem:[%s1128_s3] ss:$0 sm:$0xff] }
  0xfb   :  { %301 = vst.msk [vmem:[#allocation2 + $0x8] sm:$0xff] %vm25_vm0, %v284_v31 }
  0xfd   :  { %v893_v34 = vpop.f32.mrb[4].mxu0 }
  0xfe   :  { %v289_v36 = vadd.f32 %v893_v34, %v48_v32  ;;  %v236_v37 = vpop.f32.mrb[5].mxu0 }
  0xff   :  { %v287_v39 = vadd.f32 %v236_v37, %v46_v33  ;;  %v894_v40 = vpop.f32.mrb[6].mxu0  ;;  %v321_v49 = vld [vmem:[#allocation2 + $0x10] sm:$0xff] }
 0x100   :  { %306 = vst.msk [vmem:[#allocation2 + $0x30] sm:$0xff] %vm25_vm0, %v289_v36  ;;  %v290_v41 = vadd.f32 %v894_v40, %v49_v35  ;;  %v239_v42 = vpop.f32.mrb[7].mxu0  ;;  %v319_v45 = vld [vmem:[#allocation2] sm:$0xff] }
 0x101   :  { %304 = vst.msk [vmem:[#allocation2 + $0x20] sm:$0xff] %vm25_vm0, %v287_v39  ;;  %v288_v43 = vadd.f32 %v239_v42, %v47_v38  ;;  %v322_v44 = vld [vmem:[#allocation2 + $0x18] sm:$0xff] }
 0x102   :  { %307 = vst.msk [vmem:[#allocation2 + $0x38] sm:$0xff] %vm25_vm0, %v290_v41  ;;  %v320_v46 = vld [vmem:[#allocation2 + $0x8] sm:$0xff]  ;;  %v336_v51 = vpack.c.bf16 %v322_v44, %v321_v49 }
 0x103   :  { %305 = vst.msk [vmem:[#allocation2 + $0x28] sm:$0xff] %vm25_vm0, %v288_v43  ;;  %v335_v48 = vpack.c.bf16 %v320_v46, %v319_v45 }
 0x105   :  { %v897_v53 = vpop.f32.mrb[8].mxu0  ;;  %905 = vmatprep.mubr.msk.bf16.mxu1 %vm25_vm0, %v335_v48 }
 0x106   :  { %v293_v55 = vadd.f32 %v897_v53, %v52_v47  ;;  %v252_v56 = vpop.f32.mrb[9].mxu0  ;;  %906 = vmatmul.mubr.msk.bf16.vlgmr.msra.gmra.mrb[0].mxu1 %vm25_vm0, %v336_v51 }
 0x107   :  { %v291_v58 = vadd.f32 %v252_v56, %v50_v50  ;;  %v898_v59 = vpop.f32.mrb[10].mxu0  ;;  %922 = vmatpush3.bf16.msra.mxu1 %v959_v19  ;;  %v325_v4 = vld [vmem:[#allocation2 + $0x30] sm:$0xff] }
 0x108   :  { %310 = vst.msk [vmem:[#allocation2 + $0x50] sm:$0xff] %vm25_vm0, %v293_v55  ;;  %v294_v60 = vadd.f32 %v898_v59, %v53_v54  ;;  %v255_v61 = vpop.f32.mrb[11].mxu0  ;;  %923 = vmatprep.subr.bf16.mxu1 %v960_v52  ;;  %v323_v0 = vld [vmem:[#allocation2 + $0x20] sm:$0xff] }
 0x109   :  { %308 = vst.msk [vmem:[#allocation2 + $0x40] sm:$0xff] %vm25_vm0, %v291_v58  ;;  %v292_v62 = vadd.f32 %v255_v61, %v51_v57  ;;  %v326_v63 = vld [vmem:[#allocation2 + $0x38] sm:$0xff] }
 0x10a   :  { %311 = vst.msk [vmem:[#allocation2 + $0x58] sm:$0xff] %vm25_vm0, %v294_v60  ;;  %v324_v1 = vld [vmem:[#allocation2 + $0x28] sm:$0xff]  ;;  %v338_v6 = vpack.c.bf16 %v326_v63, %v325_v4 }
 0x10b   :  { %309 = vst.msk [vmem:[#allocation2 + $0x48] sm:$0xff] %vm25_vm0, %v292_v62  ;;  %v337_v3 = vpack.c.bf16 %v324_v1, %v323_v0  ;;  %924 = vmatpush3.bf16.msra.mxu1 %v960_v52 }
 0x10d   :  { %v901_v7 = vpop.f32.mrb[12].mxu0  ;;  %909 = vmatprep.mubr.msk.bf16.mxu1 %vm25_vm0, %v337_v3 }
 0x10e   :  { %v297_v9 = vadd.f32 %v901_v7, %v56_v2  ;;  %v268_v10 = vpop.f32.mrb[13].mxu0  ;;  %910 = vmatmul.mubr.msk.bf16.gmra.mrb[4].mxu1 %vm25_vm0, %v338_v6 }
 0x10f   :  { %v295_v12 = vadd.f32 %v268_v10, %v54_v5  ;;  %v902_v13 = vpop.f32.mrb[14].mxu0  ;;  %v329_v21 = vld [vmem:[#allocation2 + $0x50] sm:$0xff] }
 0x110   :  { %314 = vst.msk [vmem:[#allocation2 + $0x70] sm:$0xff] %vm25_vm0, %v297_v9  ;;  %v298_v14 = vadd.f32 %v902_v13, %v57_v8  ;;  %v271_v15 = vpop.f32.mrb[15].mxu0  ;;  %v327_v18 = vld [vmem:[#allocation2 + $0x40] sm:$0xff] }
 0x111   :  { %312 = vst.msk [vmem:[#allocation2 + $0x60] sm:$0xff] %vm25_vm0, %v295_v12  ;;  %v296_v16 = vadd.f32 %v271_v15, %v55_v11  ;;  %v330_v17 = vld [vmem:[#allocation2 + $0x58] sm:$0xff] }
 0x112   :  { %315 = vst.msk [vmem:[#allocation2 + $0x78] sm:$0xff] %vm25_vm0, %v298_v14  ;;  %v328_v19 = vld [vmem:[#allocation2 + $0x48] sm:$0xff]  ;;  %v340_v22 = vpack.c.bf16 %v330_v17, %v329_v21 }
 0x113   :  { %313 = vst.msk [vmem:[#allocation2 + $0x68] sm:$0xff] %vm25_vm0, %v296_v16  ;;  %v339_v20 = vpack.c.bf16 %v328_v19, %v327_v18 }
 0x115   :  { %913 = vmatprep.mubr.msk.bf16.mxu1 %vm25_vm0, %v339_v20 }
 0x116   :  { %914 = vmatmul.mubr.msk.bf16.gmra.mrb[8].mxu1 %vm25_vm0, %v340_v22 }
 0x117   :  { %v333_v27 = vld [vmem:[#allocation2 + $0x70] sm:$0xff] }
 0x118   :  { %v331_v24 = vld [vmem:[#allocation2 + $0x60] sm:$0xff] }
 0x119   :  { %v334_v23 = vld [vmem:[#allocation2 + $0x78] sm:$0xff] }
 0x11a   :  { %v332_v25 = vld [vmem:[#allocation2 + $0x68] sm:$0xff]  ;;  %v342_v28 = vpack.c.bf16 %v334_v23, %v333_v27 }
 0x11b   :  { %v341_v26 = vpack.c.bf16 %v332_v25, %v331_v24 }
 0x11d   :  { %917 = vmatprep.mubr.msk.bf16.mxu1 %vm25_vm0, %v341_v26 }
 0x11e   :  { %918 = vmatmul.mubr.msk.bf16.gmra.mrb[12].mxu1 %vm25_vm0, %v342_v28 }
 0x1d9   :  { %v907_v30 = vpop.f32.mrb[0].mxu1 }
 0x1da   :  { %v422_v31 = vadd.f32 %v907_v30, %v738_v29  ;;  %v413_v32 = vpop.f32.mrb[1].mxu1 }
 0x1db   :  { %v414_v33 = vadd.f32 %v738_v29, %v413_v32  ;;  %v908_v34 = vpop.f32.mrb[2].mxu1 }
 0x1dc   :  { %v425_v35 = vadd.f32 %v908_v34, %v738_v29  ;;  %v416_v36 = vpop.f32.mrb[3].mxu1  ;;  %v478_v38 = vmax.f32 %v422_v31, 0.0 }
 0x1dd   :  { %v417_v37 = vadd.f32 %v738_v29, %v416_v36  ;;  %v476_v40 = vmax.f32 %v414_v33, 0.0 }
 0x1de   :  { %v479_v39 = vmax.f32 %v425_v35, 0.0 }
 0x1df   :  { %v477_v41 = vmax.f32 %v417_v37, 0.0 }
 0x1e0   :  { %v493_v42 = vpack.c.bf16 %v479_v39, %v478_v38 }
 0x1e1   :  { %v492_v43 = vpack.c.bf16 %v477_v41, %v476_v40  ;;  %v911_v44 = vpop.f32.mrb[4].mxu1 }
 0x1e2   :  { %v438_v45 = vadd.f32 %v911_v44, %v738_v29  ;;  %v429_v46 = vpop.f32.mrb[5].mxu1 }
 0x1e3   :  { %v430_v47 = vadd.f32 %v738_v29, %v429_v46  ;;  %v912_v48 = vpop.f32.mrb[6].mxu1  ;;  %925 = vmatprep.mubr.msk.bf16.mxu1 %vm516_vm2, %v492_v43 }
 0x1e4   :  { %v441_v49 = vadd.f32 %v912_v48, %v738_v29  ;;  %v432_v50 = vpop.f32.mrb[7].mxu1  ;;  %926 = vmatmul.mubr.msk.bf16.vlgmr.msra.gmra.mrb[16].mxu1 %vm516_vm2, %v493_v42  ;;  %v482_v52 = vmax.f32 %v438_v45, 0.0 }
 0x1e5   :  { %v433_v51 = vadd.f32 %v738_v29, %v432_v50  ;;  %v480_v54 = vmax.f32 %v430_v47, 0.0 }
 0x1e6   :  { %v483_v53 = vmax.f32 %v441_v49, 0.0 }
 0x1e7   :  { %v481_v55 = vmax.f32 %v433_v51, 0.0 }
 0x1e8   :  { %v495_v56 = vpack.c.bf16 %v483_v53, %v482_v52 }
 0x1e9   :  { %v494_v57 = vpack.c.bf16 %v481_v55, %v480_v54  ;;  %v915_v58 = vpop.f32.mrb[8].mxu1 }
 0x1ea   :  { %v454_v59 = vadd.f32 %v915_v58, %v738_v29  ;;  %v445_v60 = vpop.f32.mrb[9].mxu1 }
 0x1eb   :  { %v446_v61 = vadd.f32 %v738_v29, %v445_v60  ;;  %v916_v62 = vpop.f32.mrb[10].mxu1  ;;  %929 = vmatprep.mubr.msk.bf16.mxu1 %vm516_vm2, %v494_v57 }
 0x1ec   :  { %v457_v63 = vadd.f32 %v916_v62, %v738_v29  ;;  %v448_v0 = vpop.f32.mrb[11].mxu1  ;;  %930 = vmatmul.mubr.msk.bf16.gmra.mrb[20].mxu1 %vm516_vm2, %v495_v56  ;;  %v486_v2 = vmax.f32 %v454_v59, 0.0 }
 0x1ed   :  { %v449_v1 = vadd.f32 %v738_v29, %v448_v0  ;;  %v484_v4 = vmax.f32 %v446_v61, 0.0 }
 0x1ee   :  { %v487_v3 = vmax.f32 %v457_v63, 0.0 }
 0x1ef   :  { %v485_v5 = vmax.f32 %v449_v1, 0.0 }
 0x1f0   :  { %v497_v6 = vpack.c.bf16 %v487_v3, %v486_v2 }
 0x1f1   :  { %v496_v7 = vpack.c.bf16 %v485_v5, %v484_v4  ;;  %v919_v8 = vpop.f32.mrb[12].mxu1 }
 0x1f2   :  { %v470_v9 = vadd.f32 %v919_v8, %v738_v29  ;;  %v461_v10 = vpop.f32.mrb[13].mxu1 }
 0x1f3   :  { %v462_v11 = vadd.f32 %v738_v29, %v461_v10  ;;  %v920_v12 = vpop.f32.mrb[14].mxu1  ;;  %933 = vmatprep.mubr.msk.bf16.mxu1 %vm516_vm2, %v496_v7 }
 0x1f4   :  { %v473_v13 = vadd.f32 %v920_v12, %v738_v29  ;;  %v464_v14 = vpop.f32.mrb[15].mxu1  ;;  %934 = vmatmul.mubr.msk.bf16.gmra.mrb[24].mxu1 %vm516_vm2, %v497_v6  ;;  %v490_v16 = vmax.f32 %v470_v9, 0.0 }
 0x1f5   :  { %v465_v15 = vadd.f32 %v738_v29, %v464_v14  ;;  %v488_v18 = vmax.f32 %v462_v11, 0.0 }
 0x1f6   :  { %v491_v17 = vmax.f32 %v473_v13, 0.0 }
 0x1f7   :  { %v489_v19 = vmax.f32 %v465_v15, 0.0 }
 0x1f8   :  { %v499_v20 = vpack.c.bf16 %v491_v17, %v490_v16 }
 0x1f9   :  { %v498_v21 = vpack.c.bf16 %v489_v19, %v488_v18 }
 0x1fb   :  { %937 = vmatprep.mubr.msk.bf16.mxu1 %vm516_vm2, %v498_v21 }
 0x1fc   :  { %938 = vmatmul.mubr.msk.bf16.gmra.mrb[28].mxu1 %vm516_vm2, %v499_v20 }
 0x2b7   :  { %v927_v22 = vpop.f32.mrb[16].mxu1 }
 0x2b8   :  { %v575_v23 = vpop.f32.mrb[17].mxu1 }
 0x2b9   :  { %v928_v24 = vpop.f32.mrb[18].mxu1 }
 0x2ba   :  { %v797_v25 = vpack.c.bf16 %v928_v24, %v927_v22  ;;  %v578_v26 = vpop.f32.mrb[19].mxu1 }
 0x2bb   :  { %v792_v27 = vpack.c.bf16 %v578_v26, %v575_v23 }
 0x2bc   :  { %829 = vst [vmem:[%s1129_s5 + $0x8] sm:$0xff] %v797_v25  }
 0x2bd   :  { %793 = vst [vmem:[%s1129_s5] sm:$0xff] %v792_v27  }
 0x2bf   :  { %v931_v28 = vpop.f32.mrb[20].mxu1 }
 0x2c0   :  { %v591_v29 = vpop.f32.mrb[21].mxu1 }
 0x2c1   :  { %v932_v30 = vpop.f32.mrb[22].mxu1 }
 0x2c2   :  { %v807_v31 = vpack.c.bf16 %v932_v30, %v931_v28  ;;  %v594_v32 = vpop.f32.mrb[23].mxu1 }
 0x2c3   :  { %v802_v33 = vpack.c.bf16 %v594_v32, %v591_v29 }
 0x2c4   :  { %831 = vst [vmem:[%s1129_s5 + $0x18] sm:$0xff] %v807_v31  }
 0x2c5   :  { %830 = vst [vmem:[%s1129_s5 + $0x10] sm:$0xff] %v802_v33  }
 0x2c7   :  { %v935_v34 = vpop.f32.mrb[24].mxu1 }
 0x2c8   :  { %v607_v35 = vpop.f32.mrb[25].mxu1 }
 0x2c9   :  { %v936_v36 = vpop.f32.mrb[26].mxu1 }
 0x2ca   :  { %v817_v37 = vpack.c.bf16 %v936_v36, %v935_v34  ;;  %v610_v38 = vpop.f32.mrb[27].mxu1 }
 0x2cb   :  { %v812_v39 = vpack.c.bf16 %v610_v38, %v607_v35 }
 0x2cc   :  { %833 = vst [vmem:[%s1129_s5 + $0x28] sm:$0xff] %v817_v37  }
 0x2cd   :  { %832 = vst [vmem:[%s1129_s5 + $0x20] sm:$0xff] %v812_v39  }
 0x2cf   :  { %v939_v40 = vpop.f32.mrb[28].mxu1 }
 0x2d0   :  { %v623_v41 = vpop.f32.mrb[29].mxu1 }
 0x2d1   :  { %v940_v42 = vpop.f32.mrb[30].mxu1 }
 0x2d2   :  { %v827_v43 = vpack.c.bf16 %v940_v42, %v939_v40  ;;  %v626_v44 = vpop.f32.mrb[31].mxu1 }
 0x2d3   :  { %v822_v45 = vpack.c.bf16 %v626_v44, %v623_v41 }
 0x2d4   :  { %835 = vst [vmem:[%s1129_s5 + $0x38] sm:$0xff] %v827_v43  }
 0x2d5   :  { %834 = vst [vmem:[%s1129_s5 + $0x30] sm:$0xff] %v822_v45  }

</bundles_post_ra>
